<compile_context>
chip_gen: v6e
topology: v6e:2x2x1
jax: 0.10.0
libtpu: 0.0.40
codegen_flags: <defaults>
</compile_context>

<pallas_src>
import functools
import math

import jax
import jax.numpy as jnp
from jax import lax
from jax.experimental import pallas as pl
from jax.experimental.pallas import tpu as pltpu


# ----------------------------------------------------------------------------
# Kernel 1 & 3: tiled, software-pipelined linear projection  out = x @ w + b
# ----------------------------------------------------------------------------
def _linear_kernel(x_ref, w_ref, b_ref, o_ref, acc_ref):
    @pl.when(pl.program_id(2) == 0)
    def _init():
        acc_ref[...] = jnp.zeros_like(acc_ref)

    acc_ref[...] += jnp.dot(
        x_ref[...], w_ref[...], preferred_element_type=jnp.float32
    )

    @pl.when(pl.program_id(2) == pl.num_programs(2) - 1)
    def _finalize():
        o_ref[...] = (acc_ref[...] + b_ref[...]).astype(o_ref.dtype)


def _pick_tile(dim, target, step):
    """Largest tile <= target that divides `dim` and is a multiple of `step`
    (falls back to the full dim, which BlockSpec always accepts)."""
    if dim <= target:
        return dim
    t = (target // step) * step
    while t >= step:
        if dim % t == 0:
            return t
        t -= step
    return dim


def linear(x2d, w, b, *, tm_target=256, tn_target=256, tk_target=512):
    M, K = x2d.shape
    N = w.shape[1]
    # Tile budgets chosen to fit comfortably inside the default scoped VMEM
    # on all of v5e / v6e / v7x (double-buffered inputs + f32 accumulator).
    tm = _pick_tile(M, tm_target, 8)
    tn = _pick_tile(N, tn_target, 128)
    tk = _pick_tile(K, tk_target, 128)
    grid = (M // tm, N // tn, K // tk)
    return pl.pallas_call(
        _linear_kernel,
        out_shape=jax.ShapeDtypeStruct((M, N), x2d.dtype),
        grid_spec=pltpu.PrefetchScalarGridSpec(
            num_scalar_prefetch=0,
            grid=grid,
            in_specs=[
                pl.BlockSpec((tm, tk), lambda i, j, k: (i, k)),
                pl.BlockSpec((tk, tn), lambda i, j, k: (k, j)),
                pl.BlockSpec((1, tn), lambda i, j, k: (0, j)),
            ],
            out_specs=pl.BlockSpec((tm, tn), lambda i, j, k: (i, j)),
            scratch_shapes=[pltpu.VMEM((tm, tn), jnp.float32)],
        ),
        compiler_params=pltpu.CompilerParams(
            dimension_semantics=("parallel", "parallel", "arbitrary"),
        ),
    )(x2d, w, b.reshape(1, N))


# ----------------------------------------------------------------------------
# Kernel 2: attention.  One grid step = one batch element, all heads.
# Reads the fused (S, 3D) qkv slab directly (no transposes / splits in HBM)
# and writes a single lane-dense (S, D) output slab.
# ----------------------------------------------------------------------------
def _attention_kernel(qkv_ref, o_ref, *, n_heads, d_head, scale, causal, seq_len):
    d_model = n_heads * d_head
    qkv = qkv_ref[...]                       # (S, 3*D) — one lane-dense load

    if causal:
        # Build the mask once; reused by every head.
        row = lax.broadcasted_iota(jnp.int32, (seq_len, seq_len), 0)
        col = lax.broadcasted_iota(jnp.int32, (seq_len, seq_len), 1)
        neg_mask = col > row

    for h in range(n_heads):                 # static unrolled head loop
        lo = h * d_head
        q = qkv[:, lo:lo + d_head] * scale   # fold 1/sqrt(d_h) into q
        k = qkv[:, d_model + lo:d_model + lo + d_head]
        v = qkv[:, 2 * d_model + lo:2 * d_model + lo + d_head]

        # q @ k^T via last-dim contraction (no explicit transpose of k).
        s = lax.dot_general(
            q, k, (((1,), (1,)), ((), ())), preferred_element_type=jnp.float32
        )                                    # (S, S)
        if causal:
            # mask then scale in PyTorch; scale is folded into q above and
            # (-inf) * scale == -inf, so the result is identical.
            s = jnp.where(neg_mask, -jnp.inf, s)

        s = s - jnp.max(s, axis=-1, keepdims=True)
        p = jnp.exp(s)
        p = p * pl.reciprocal(jnp.sum(p, axis=-1, keepdims=True), approx=True)

        out_h = jnp.dot(p.astype(v.dtype), v, preferred_element_type=jnp.float32)
        # Assemble the lane-dense (S, D) slab in VMEM; the HBM writeback then
        # happens as one dense block per batch element.
        o_ref[:, lo:lo + d_head] = out_h.astype(o_ref.dtype)


def attention(qkv, *, n_heads, d_head, causal):
    B, S, three_d = qkv.shape
    d_model = n_heads * d_head
    scale = 1.0 / math.sqrt(d_head)
    kernel = functools.partial(
        _attention_kernel,
        n_heads=n_heads,
        d_head=d_head,
        scale=scale,
        causal=causal,
        seq_len=S,
    )
    return pl.pallas_call(
        kernel,
        out_shape=jax.ShapeDtypeStruct((B, S, d_model), qkv.dtype),
        grid=(B,),
        in_specs=[pl.BlockSpec((None, S, three_d), lambda b: (b, 0, 0))],
        out_specs=pl.BlockSpec((None, S, d_model), lambda b: (b, 0, 0)),
        compiler_params=pltpu.CompilerParams(
            dimension_semantics=("parallel",),
        ),
    )(qkv)


# ----------------------------------------------------------------------------
# Full module forward.
# ----------------------------------------------------------------------------
def auto_atencao_forward(x, params, n_cabecas, mascara_causal=False):
    B, S, D = x.shape
    d_cabeca = D // n_cabecas

    # proj_entrada: (B*S, D) @ (D, 3D) + b  ->  (B*S, 3D)
    qkv = linear(x.reshape(B * S, D), params["w_in"], params["b_in"])
    # Free reshape only — no head transpose / split materialized in HBM; the
    # attention kernel slices the [q | k | v] (per-head-contiguous) columns.
    qkv = qkv.reshape(B, S, 3 * D)

    attn = attention(qkv, n_heads=n_cabecas, d_head=d_cabeca,
                     causal=mascara_causal)            # (B, S, D), lane-dense

    # proj_saida
    out = linear(attn.reshape(B * S, D), params["w_out"], params["b_out"])
    return out.reshape(B, S, D)


# Pure-JAX reference (mirrors the PyTorch forward) for a correctness check.
def auto_atencao_reference(x, params, n_cabecas, mascara_causal=False):
    B, S, D = x.shape
    dh = D // n_cabecas
    qkv = x @ params["w_in"] + params["b_in"]
    q, k, v = jnp.split(qkv, 3, axis=-1)
    q, k, v = map(
        lambda t: t.reshape(B, S, n_cabecas, dh).transpose(0, 2, 1, 3), (q, k, v)
    )
    pesos = jnp.einsum("bhqd,bhkd->bhqk", q, k)
    if mascara_causal:
        mask = jnp.triu(jnp.ones((S, S), dtype=bool), 1)
        pesos = jnp.where(mask, -jnp.inf, pesos)
    pesos = pesos / math.sqrt(dh)
    pesos = jax.nn.softmax(pesos, axis=-1)
    saida = jnp.einsum("bhqk,bhkd->bhqd", pesos, v)
    saida = saida.transpose(0, 2, 1, 3).reshape(B, S, D)
    return saida @ params["w_out"] + params["b_out"]


def init_params(key, d_emb):
    k1, k2, k3, k4 = jax.random.split(key, 4)
    bound = 1.0 / math.sqrt(d_emb)
    return {
        "w_in": jax.random.uniform(k1, (d_emb, 3 * d_emb), jnp.float32, -bound, bound),
        "b_in": jax.random.uniform(k2, (3 * d_emb,), jnp.float32, -bound, bound),
        "w_out": jax.random.uniform(k3, (d_emb, d_emb), jnp.float32, -bound, bound),
        "b_out": jax.random.uniform(k4, (d_emb,), jnp.float32, -bound, bound),
    }


if __name__ == "__main__":
    key = jax.random.PRNGKey(0)
    kx, kp = jax.random.split(key)

    batch, seq, d_emb, n_cabecas = 2, 8, 32, 4
    x = jax.random.normal(kx, (batch, seq, d_emb), jnp.float32)
    params = init_params(kp, d_emb)

    for causal in (True, False):
        out = auto_atencao_forward(x, params, n_cabecas, mascara_causal=causal)
        out = jax.block_until_ready(out)
        ref = auto_atencao_reference(x, params, n_cabecas, mascara_causal=causal)
        assert out.shape == (batch, seq, d_emb)
        # approx reciprocal in the softmax denominator -> slightly looser tol.
        assert jnp.allclose(out, ref, atol=2e-3, rtol=2e-3), (
            f"mismatch (causal={causal}): "
            f"max abs err = {jnp.max(jnp.abs(out - ref))}"
        )

    print("KERNEL_OK")
</pallas_src>

<mosaic_0001>
module attributes {stable_mosaic.version = 11 : i64} {
  func.func @_linear_kernel(%arg0: i32, %arg1: i32, %arg2: i32, %arg3: memref<16x32xf32, #tpu.memory_space<vmem>>, %arg4: memref<32x96xf32, #tpu.memory_space<vmem>>, %arg5: memref<1x96xf32, #tpu.memory_space<vmem>>, %arg6: memref<16x96xf32, #tpu.memory_space<vmem>>, %arg7: memref<16x96xf32, #tpu.memory_space<vmem>>) attributes {dimension_semantics = [#tpu.dimension_semantics<parallel>, #tpu.dimension_semantics<parallel>, #tpu.dimension_semantics<arbitrary>], iteration_bounds = array<i64: 1, 1, 1>, scalar_prefetch = 0 : i64, scratch_operands = 1 : i64, tpu.core_type = #tpu.core_type<tc>, window_params = [{transform_indices = @transform_0, window_bounds = array<i64: 16, 32>}, {transform_indices = @transform_1, window_bounds = array<i64: 32, 96>}, {transform_indices = @transform_2, window_bounds = array<i64: 1, 96>}, {transform_indices = @transform_3, window_bounds = array<i64: 16, 96>}]} {
    %c0_i32 = arith.constant 0 : i32
    %0 = arith.cmpi eq, %arg2, %c0_i32 : i32
    %1 = arith.extui %0 : i1 to i32
    %c0_i32_0 = arith.constant 0 : i32
    %2 = arith.cmpi ne, %1, %c0_i32_0 : i32
    scf.if %2 {
      %cst_10 = arith.constant 0.000000e+00 : f32
      %12 = vector.broadcast %cst_10 : f32 to vector<16x96xf32>
      %c0_11 = arith.constant 0 : index
      %c0_12 = arith.constant 0 : index
      %13 = vector.load %arg7[%c0_11, %c0_12] : memref<16x96xf32, #tpu.memory_space<vmem>>, vector<16x96xf32>
      tpu.vector_store %arg7[%c0_11, %c0_12], %12 {strides = array<i32>} : memref<16x96xf32, #tpu.memory_space<vmem>>, vector<16x96xf32>,
    } else {
    }
    %c0 = arith.constant 0 : index
    %c0_1 = arith.constant 0 : index
    %3 = vector.load %arg7[%c0, %c0_1] : memref<16x96xf32, #tpu.memory_space<vmem>>, vector<16x96xf32>
    %c0_2 = arith.constant 0 : index
    %c0_3 = arith.constant 0 : index
    %4 = vector.load %arg3[%c0_2, %c0_3] : memref<16x32xf32, #tpu.memory_space<vmem>>, vector<16x32xf32>
    %c0_4 = arith.constant 0 : index
    %c0_5 = arith.constant 0 : index
    %5 = vector.load %arg4[%c0_4, %c0_5] : memref<32x96xf32, #tpu.memory_space<vmem>>, vector<32x96xf32>
    %cst = arith.constant dense<0.000000e+00> : vector<16x96xf32>
    %6 = tpu.matmul %4, %5, %cst {dimension_numbers = #tpu.dot_dimension_numbers<[1], [0], [0], [1], [0, 0, 1, 1], [], []>} : vector<16x32xf32>, vector<32x96xf32>, vector<16x96xf32> -> vector<16x96xf32>
    %7 = arith.addf %3, %6 : vector<16x96xf32>
    %c0_6 = arith.constant 0 : index
    %c0_7 = arith.constant 0 : index
    %8 = vector.load %arg7[%c0_6, %c0_7] : memref<16x96xf32, #tpu.memory_space<vmem>>, vector<16x96xf32>
    tpu.vector_store %arg7[%c0_6, %c0_7], %7 {strides = array<i32>} : memref<16x96xf32, #tpu.memory_space<vmem>>, vector<16x96xf32>,
    %c0_i32_8 = arith.constant 0 : i32
    %9 = arith.cmpi eq, %arg2, %c0_i32_8 : i32
    %10 = arith.extui %9 : i1 to i32
    %c0_i32_9 = arith.constant 0 : i32
    %11 = arith.cmpi ne, %10, %c0_i32_9 : i32
    scf.if %11 {
      %c0_10 = arith.constant 0 : index
      %c0_11 = arith.constant 0 : index
      %12 = vector.load %arg7[%c0_10, %c0_11] : memref<16x96xf32, #tpu.memory_space<vmem>>, vector<16x96xf32>
      %c0_12 = arith.constant 0 : index
      %c0_13 = arith.constant 0 : index
      %13 = vector.load %arg5[%c0_12, %c0_13] : memref<1x96xf32, #tpu.memory_space<vmem>>, vector<1x96xf32>
      %14 = vector.broadcast %13 : vector<1x96xf32> to vector<16x96xf32>
      %15 = arith.addf %12, %14 : vector<16x96xf32>
      %c0_14 = arith.constant 0 : index
      %c0_15 = arith.constant 0 : index
      %16 = vector.load %arg6[%c0_14, %c0_15] : memref<16x96xf32, #tpu.memory_space<vmem>>, vector<16x96xf32>
      tpu.vector_store %arg6[%c0_14, %c0_15], %15 {strides = array<i32>} : memref<16x96xf32, #tpu.memory_space<vmem>>, vector<16x96xf32>,
    } else {
    }
    return
  }
  func.func @transform_0(%arg0: i32, %arg1: i32, %arg2: i32) -> (i32, i32) {
    %c0_i32 = arith.constant 0 : i32
    return %arg0, %arg2 : i32, i32
  }
  func.func @transform_1(%arg0: i32, %arg1: i32, %arg2: i32) -> (i32, i32) {
    %c0_i32 = arith.constant 0 : i32
    return %arg2, %arg1 : i32, i32
  }
  func.func @transform_2(%arg0: i32, %arg1: i32, %arg2: i32) -> (i32, i32) {
    %c0_i32 = arith.constant 0 : i32
    %c0_i32_0 = arith.constant 0 : i32
    return %c0_i32, %arg1 : i32, i32
  }
  func.func @transform_3(%arg0: i32, %arg1: i32, %arg2: i32) -> (i32, i32) {
    %c0_i32 = arith.constant 0 : i32
    return %arg0, %arg1 : i32, i32
  }
}

</mosaic_0001>

<bundles_post_ra>
// kernel: tpu_custom_call.1
= control target key start
LH: loop header
LB: loop body
LE: loop exit
PB: predicated region body
PF: predicated region fallthrough
CT: control target
= control target key end

     0   :  { %8 = vsyncpa [#allocation4], 0  ;;  %s326_s0 = inlined_call_operand.hbm [shape: f32[16,32], index: 0, kind: input, shape index: {}]   ;;  %s327_s1 = inlined_call_operand.hbm [shape: f32[32,96], index: 1, kind: input, shape index: {}]   ;;  %s328_s2 = inlined_call_operand.vmem [shape: f32[1,96], index: 2, kind: input, shape index: {}]   ;;  %s329_s3 = inlined_call_operand.hbm [shape: f32[16,96], index: 3, kind: output, shape index: {}]  }
   0x1   :  { %9 = vsyncpa [#allocation7], 0 }
   0x2   :  { %10 = vsyncpa [#allocation5], 0  ;;  %s271_s12 = smov [#allocation3]  }
   0x3   :  { %s16_s13 = sshll.u32 %s271_s12, 4  ;;  %s17_s13 = int_to_ptr.vmem [resolvable:$true] %s16_s13 }
   0x4   :  { %s213_s14 = scalar_lea.vmem %s17_s13, 256  ;;  %p218_p1 = scmp.lt.s32.totalorder %s17_s13, %s17_s13 }
   0x5   :  { %p214_p0 = scmp.ne.s32.totalorder %s17_s13, %s213_s14  ;;  %p219_p2 = scmp.lt.s32.totalorder %s213_s14, %s213_s14 }
   0x7   :  { %p220_p3 = por %p219_p2, %p218_p1 }
   0x9   :  { %p221_p4 = pnand %p220_p3, %p214_p0 }
   0xb   :  { %224 = shalt.err (!%p221_p4)
}
   0xc   :  { %s272_s15 = smov 128   ;;  %s273_s16 = smov 8  }
   0xd   :  { %22 = dma.hbm_to_vmem [thread:$0]  %s326_s0, 256, %s17_s13, [#allocation4], %s272_s15, %s272_s15, %s273_s16  }
   0xe   :  { %s274_s19 = smov [#allocation6]  }
   0xf   :  { %s28_s20 = sshll.u32 %s274_s19, 4  ;;  %s29_s20 = int_to_ptr.vmem [resolvable:$true] %s28_s20 }
  0x10   :  { %s233_s21 = scalar_lea.vmem %s29_s20, 512  ;;  %p238_p6 = scmp.lt.s32.totalorder %s29_s20, %s29_s20 }
  0x11   :  { %p234_p5 = scmp.ne.s32.totalorder %s29_s20, %s233_s21  ;;  %p239_p7 = scmp.lt.s32.totalorder %s233_s21, %s233_s21 }
  0x13   :  { %p240_p8 = por %p239_p7, %p238_p6 }
  0x15   :  { %p241_p9 = pnand %p240_p8, %p234_p5 }
  0x17   :  { %244 = shalt.err (!%p241_p9)
}
  0x18   :  { %34 = dma.hbm_to_vmem [thread:$0]  %s327_s1, 512, %s29_s20, [#allocation7], %s272_s15, %s272_s15, %s273_s16  }
  0x19   :  { %265 = dma.done.wait [#allocation4], 256  }
  0x1a   :  { %266 = vsyncadd [#allocation4], 4294967040 }
  0x1b   :  { %267 = dma.done.wait [#allocation7], 512  }
  0x1c   :  { %268 = vsyncadd [#allocation7], 4294966784  ;;  %vm47_vm0 = vcmask 785408   ;;  %v275_v0 = vmov 0.0   ;;  %vm58_vm1 = vcmask 261120   ;;  %v57_v1 = vld [vmem:[#allocation6 + $0x18] sm:$0xff] }
  0x1d   :  { %49 = vst.msk [vmem:[#allocation2 + $0x8] sm:$0xff] %vm47_vm0, %v275_v0  ;;  %48 = vst.msk [vmem:[#allocation2] sm:$0xff] %vm47_vm0, %v275_v0  ;;  %v56_v2 = vld [vmem:[#allocation6 + $0x10] sm:$0xff]  ;;  %188 = vmatprep.subr.mxu0 %v57_v1  ;;  %v55_v4 = vld [vmem:[#allocation6 + $0x8] sm:$0xff]  ;;  %s276_s24 = smov [#allocation8]  }
  0x1e   :  { %v52_v3 = vld [vmem:[#allocation3] sm:$0xff]  ;;  %189 = vmatpush3.msra.mxu0 %v57_v1  ;;  %v54_v5 = vld [vmem:[#allocation6] sm:$0xff]  ;;  %v53_v6 = vld [vmem:[#allocation3 + $0x8] sm:$0xff]  ;;  %s166_s25 = sshll.u32 %s276_s24, 4  ;;  %s167_s25 = int_to_ptr.vmem [resolvable:$true] %s166_s25 }
  0x1f   :  { %196 = vmatprep.mubr.msk.f32.mxu0 %vm58_vm1, %v52_v3  ;;  %190 = vmatprep.subr.mxu0 %v56_v2  ;;  %v181_v13 = vld [vmem:[%s328_s2] ss:$0 sm:$0xff]  ;;  %s245_s26 = scalar_lea.vmem %s167_s25, 256  ;;  %p250_p11 = scmp.lt.s32.totalorder %s167_s25, %s167_s25 }
  0x20   :  { %191 = vmatpush3.msra.mxu0 %v56_v2  ;;  %p246_p10 = scmp.ne.s32.totalorder %s167_s25, %s245_s26  ;;  %p251_p12 = scmp.lt.s32.totalorder %s245_s26, %s245_s26 }
  0x21   :  { %192 = vmatprep.subr.mxu0 %v55_v4 }
  0x22   :  { %193 = vmatpush3.msra.mxu0 %v55_v4  ;;  %p252_p13 = por %p251_p12, %p250_p11 }
  0x23   :  { %194 = vmatprep.subr.mxu0 %v54_v5 }
  0x24   :  { %195 = vmatpush3.msra.mxu0 %v54_v5  ;;  %v51_v7 = vld [vmem:[#allocation2 + $0x8] sm:$0xff]  ;;  %v50_v9 = vld [vmem:[#allocation2] sm:$0xff]  ;;  %p253_p0 = pnand %p252_p13, %p246_p10 }
  0x25   :  { %197 = vmatmul.mubr.msk.f32.vlgmr.msra.gmra.mxu0 %vm58_vm1, %v53_v6 }
  0xe5   :  { %v198_v8 = vpop.f32.mrf.mxu0 }
  0xe6   :  { %v141_v10 = vadd.f32 %v198_v8, %v51_v7 }
  0xe7   :  { %v131_v11 = vpop.f32.mrf.mxu0 }
  0xe8   :  { %144 = vst.msk [vmem:[#allocation2 + $0x8] sm:$0xff] %vm47_vm0, %v141_v10  ;;  %v140_v12 = vadd.f32 %v131_v11, %v50_v9 }
  0xea   :  { %143 = vst.msk [vmem:[#allocation2] sm:$0xff] %vm47_vm0, %v140_v12 }
  0xef   :  { %v149_v14 = vld [vmem:[#allocation2 + $0x8] sm:$0xff] }
  0xf0   :  { %v158_v15 = vadd.f32 %v181_v13, %v149_v14 }
  0xf1   :  { %v148_v16 = vld [vmem:[#allocation2] sm:$0xff] }
  0xf2   :  { %v157_v17 = vadd.f32 %v181_v13, %v148_v16  ;;  %160 = vst.msk [vmem:[#allocation8 + $0x8] sm:$0xff] %vm47_vm0, %v158_v15 }
  0xf4   :  { %159 = vst.msk [vmem:[#allocation8] sm:$0xff] %vm47_vm0, %v157_v17 }
  0xf5   :  { %256 = shalt.err (!%p253_p0)
}
  0xf6   :  { %172 = dma.vmem_to_hbm [thread:$0]  %s167_s25, 256, %s329_s3, [#allocation5], %s272_s15, %s272_s15, %s273_s16  }
  0xf7   :  { %269 = dma.done.wait [#allocation5], 256  }
  0xf8   :  { %270 = vsyncadd [#allocation5], 4294967040 }
  0xf9   :  { %176 = vsyncpa [#allocation4], 1 }
  0xfa   :  { %177 = vsyncpa [#allocation7], 1 }
  0xfb   :  { %178 = vsyncpa [#allocation5], 1 }

</bundles_post_ra>
